<compile_context>
chip_gen: v7x
topology: tpu7x:2x2x1
jax: 0.10.0
libtpu: 0.0.40
codegen_flags: <defaults>
</compile_context>

<pallas_src>
import functools

import jax
import jax.numpy as jnp
from jax.experimental import pallas as pl
from jax.experimental.pallas import tpu as pltpu


# ---------------------------------------------------------------------------
# small helpers
# ---------------------------------------------------------------------------

def _round_up(x, m):
    return (x + m - 1) // m * m


def _sublane_tile(itemsize):
    # native second-minor packing: 8 rows f32, 16 rows bf16, 32 rows int8/fp8
    return 8 * (4 // itemsize)


def _vmem_budget():
    """Chip-aware scoped-VMEM limit + per-kernel tile budget (headroom kept for
    Mosaic internal scratch). v5e/v6e: 128 MiB physical -> ~96 MiB limit;
    v7x: 64 MiB physical -> ~48 MiB limit."""
    phys = 64 * 1024 * 1024            # conservative default (v7x physical VMEM)
    try:
        phys = int(pltpu.get_tpu_info().vmem_capacity_bytes)
    except Exception:
        pass
    vmem_limit = min(phys * 3 // 4, 96 * 1024 * 1024)
    budget = vmem_limit * 3 // 4
    return vmem_limit, budget


def _split_grid(n, tile, align):
    """Split the batch tiles over an outer 'parallel' axis of size <=2 (uses
    both TensorCores on v7x) and re-balance the tile size to minimise padding."""
    total_tiles = pl.cdiv(n, tile)
    num_parts = 2 if total_tiles >= 2 else 1
    inner = pl.cdiv(total_tiles, num_parts)
    tile = max(align, _round_up(pl.cdiv(n, num_parts * inner), align))
    n_pad = num_parts * inner * tile
    return num_parts, inner, tile, n_pad


# ---------------------------------------------------------------------------
# tile-size choosers (padded-footprint VMEM model)
# ---------------------------------------------------------------------------

def _choose_tn(n, c, itemsize, budget_bytes):
    """Lane-dense (small C) path: batch on the lane axis, pick TN (mult of 128)."""
    sub = _sublane_tile(itemsize)
    c_in = _round_up(c, sub)            # sublane-padded rows of the input block
    c_f32 = _round_up(c, 8)             # sublane-padded rows of the f32 temporaries
    per_col = (2 * c_in * itemsize      # double-buffered (C, TN) logits tile
               + 5 * c_f32 * 4          # live (C, TN) f32 temporaries in the body
               + 2 * 2 * 8 * 4          # (1, TN) targets + w_row blocks, 2x buffered
               + 8 * 4)                 # (1, TN) f32 partial accumulator
    tn = max(128, budget_bytes // per_col // 128 * 128)
    tn = min(tn, 32768, _round_up(n, 128))
    return tn


def _choose_tm(n, c, itemsize, budget_bytes):
    """Row-major (large C) path: classes on the lane axis, pick TM rows."""
    sub = _sublane_tile(itemsize)
    c_lane = _round_up(c, 128)          # lane-padded class extent
    per_row = (2 * c_lane * itemsize    # double-buffered (TM, C) logits tile
               + 5 * c_lane * 4         # live (TM, C) f32 temporaries
               + 2 * 2 * 128 * 4        # (TM, 1) targets + w_row blocks (lane padded)
               + 128 * 4)               # (TM, 1) f32 partial accumulator
    tm = max(sub, budget_bytes // per_row // sub * sub)
    tm = min(tm, 4096, _round_up(n, sub))
    return tm


# ---------------------------------------------------------------------------
# kernels
# ---------------------------------------------------------------------------

def _lane_dense_kernel(x_ref, tgt_ref, wrow_ref, loss_ref, acc_ref, *,
                       n_cols, tn, inv_denom):
    """Blocks: x (C, TN) logits (batch on lanes), targets/w_row (1, TN)."""
    p = pl.program_id(0)
    i = pl.program_id(1)
    inner = pl.num_programs(1)

    @pl.when(i == 0)
    def _():
        acc_ref[...] = jnp.zeros_like(acc_ref)

    x = x_ref[...].astype(jnp.float32)            # (C, TN), f32 in-kernel
    t = tgt_ref[...]                              # (1, TN) int32 targets
    w = wrow_ref[...]                             # (1, TN) f32 weight[target]
    c = x.shape[0]

    # numerically stable log-softmax pieces along the class (sublane) axis
    m = jnp.max(x, axis=0, keepdims=True)                         # (1, TN)
    shifted = x - m                                               # (C, TN)
    denom = jnp.sum(jnp.exp(shifted), axis=0, keepdims=True)      # (1, TN)

    # gather the target-class logit via a tiny (C,1) iota broadcast-compare
    cls = jax.lax.broadcasted_iota(jnp.int32, (c, 1), 0)
    shifted_t = jnp.sum(jnp.where(cls == t, shifted, 0.0),
                        axis=0, keepdims=True)                    # (1, TN)

    col_loss = w * (jnp.log(denom) - shifted_t)                   # (1, TN)

    # mask padded columns (select, not multiply, so padding can't poison sums)
    col_idx = (p * inner + i) * tn + jax.lax.broadcasted_iota(
        jnp.int32, (1, tn), 1)
    col_loss = jnp.where(col_idx < n_cols, col_loss, 0.0)

    acc_ref[...] = acc_ref[...] + col_loss

    @pl.when(i == inner - 1)
    def _():
        loss_ref[...] = (jnp.sum(acc_ref[...]) * inv_denom).reshape(1, 1, 1)


def _row_major_kernel(x_ref, tgt_ref, wrow_ref, loss_ref, acc_ref, *,
                      n_rows, tm, inv_denom):
    """Blocks: x (TM, C) logits (classes on lanes), targets/w_row (TM, 1)."""
    p = pl.program_id(0)
    i = pl.program_id(1)
    inner = pl.num_programs(1)

    @pl.when(i == 0)
    def _():
        acc_ref[...] = jnp.zeros_like(acc_ref)

    x = x_ref[...].astype(jnp.float32)            # (TM, C)
    t = tgt_ref[...]                              # (TM, 1) int32
    w = wrow_ref[...]                             # (TM, 1) f32 weight[target]
    tm_, c = x.shape

    m = jnp.max(x, axis=1, keepdims=True)                         # (TM, 1)
    shifted = x - m
    denom = jnp.sum(jnp.exp(shifted), axis=1, keepdims=True)      # (TM, 1)

    cls = jax.lax.broadcasted_iota(jnp.int32, (1, c), 1)
    shifted_t = jnp.sum(jnp.where(cls == t, shifted, 0.0),
                        axis=1, keepdims=True)                    # (TM, 1)

    row_loss = w * (jnp.log(denom) - shifted_t)                   # (TM, 1)

    row_idx = (p * inner + i) * tm + jax.lax.broadcasted_iota(
        jnp.int32, (tm_, 1), 0)
    row_loss = jnp.where(row_idx < n_rows, row_loss, 0.0)

    acc_ref[...] = acc_ref[...] + row_loss

    @pl.when(i == inner - 1)
    def _():
        loss_ref[...] = (jnp.sum(acc_ref[...]) * inv_denom).reshape(1, 1, 1)


# ---------------------------------------------------------------------------
# wrappers
# ---------------------------------------------------------------------------

def _cost(n, c, itemsize):
    return pl.CostEstimate(
        flops=int(6 * n * c),
        transcendentals=int(n * c + n),
        bytes_accessed=int(n * c * itemsize + 2 * n * 4 + 4))


def _custom_loss_lane_dense(outputs, targets, w_row, n, c, itemsize,
                            vmem_limit, budget):
    tn = _choose_tn(n, c, itemsize, budget)
    num_parts, inner, tn, n_pad = _split_grid(n, tn, 128)

    x_t = outputs.T                                   # (C, N) lane-dense layout
    if n_pad != n:
        x_t = jnp.pad(x_t, ((0, 0), (0, n_pad - n)))
        targets = jnp.pad(targets, (0, n_pad - n))
        w_row = jnp.pad(w_row, (0, n_pad - n))
    tgt2d = targets.reshape(1, n_pad)
    w2d = w_row.reshape(1, n_pad)

    kernel = functools.partial(_lane_dense_kernel, n_cols=n, tn=tn,
                               inv_denom=1.0 / (n * c))

    partials = pl.pallas_call(
        kernel,
        out_shape=jax.ShapeDtypeStruct((num_parts, 1, 1), jnp.float32),
        grid_spec=pltpu.PrefetchScalarGridSpec(
            num_scalar_prefetch=0,
            grid=(num_parts, inner),
            in_specs=[
                pl.BlockSpec((c, tn), lambda p, i: (0, p * inner + i)),
                pl.BlockSpec((1, tn), lambda p, i: (0, p * inner + i)),
                pl.BlockSpec((1, tn), lambda p, i: (0, p * inner + i)),
            ],
            out_specs=pl.BlockSpec((1, 1, 1), lambda p, i: (p, 0, 0)),
            scratch_shapes=[pltpu.VMEM((1, tn), jnp.float32)],
        ),
        compiler_params=pltpu.CompilerParams(
            dimension_semantics=("parallel", "arbitrary"),
            vmem_limit_bytes=vmem_limit,
        ),
        cost_estimate=_cost(n, c, itemsize),
    )(x_t, tgt2d, w2d)
    return jnp.sum(partials)


def _custom_loss_row_major(outputs, targets, w_row, n, c, itemsize,
                           vmem_limit, budget):
    sub = _sublane_tile(itemsize)
    tm = _choose_tm(n, c, itemsize, budget)
    num_parts, inner, tm, n_pad = _split_grid(n, tm, sub)

    if n_pad != n:
        outputs = jnp.pad(outputs, ((0, n_pad - n), (0, 0)))
        targets = jnp.pad(targets, (0, n_pad - n))
        w_row = jnp.pad(w_row, (0, n_pad - n))
    tgt2d = targets.reshape(n_pad, 1)
    w2d = w_row.reshape(n_pad, 1)

    kernel = functools.partial(_row_major_kernel, n_rows=n, tm=tm,
                               inv_denom=1.0 / (n * c))

    # TODO(synk): for TM forced small by huge C (e.g. 256k-class vocab), sweep
    # pipeline_mode=pl.Buffered(3) on the logits BlockSpec.
    partials = pl.pallas_call(
        kernel,
        out_shape=jax.ShapeDtypeStruct((num_parts, 1, 1), jnp.float32),
        grid_spec=pltpu.PrefetchScalarGridSpec(
            num_scalar_prefetch=0,
            grid=(num_parts, inner),
            in_specs=[
                pl.BlockSpec((tm, c), lambda p, i: (p * inner + i, 0)),
                pl.BlockSpec((tm, 1), lambda p, i: (p * inner + i, 0)),
                pl.BlockSpec((tm, 1), lambda p, i: (p * inner + i, 0)),
            ],
            out_specs=pl.BlockSpec((1, 1, 1), lambda p, i: (p, 0, 0)),
            scratch_shapes=[pltpu.VMEM((tm, 1), jnp.float32)],
        ),
        compiler_params=pltpu.CompilerParams(
            dimension_semantics=("parallel", "arbitrary"),
            vmem_limit_bytes=vmem_limit,
        ),
        cost_estimate=_cost(n, c, itemsize),
    )(outputs, tgt2d, w2d)
    return jnp.sum(partials)


def custom_loss(outputs, targets, weight):
    """outputs: [N, C] (f32/bf16), targets: [N] int, weight: [C] -> scalar f32.

    Equals mean_{n,c}(weight[c] * (-onehot(targets)[n,c] * log_softmax(outputs)[n,c])).
    """
    n, c = outputs.shape
    targets = targets.astype(jnp.int32)
    # per-row weight gathered once in XLA (removes a (tile, C) select+reduce per step)
    w_row = weight.astype(jnp.float32)[targets]

    itemsize = jnp.dtype(outputs.dtype).itemsize
    vmem_limit, budget = _vmem_budget()

    if c < 128:
        # tiny class count: lane-dense transposed layout
        return _custom_loss_lane_dense(outputs, targets, w_row, n, c,
                                       itemsize, vmem_limit, budget)
    return _custom_loss_row_major(outputs, targets, w_row, n, c,
                                  itemsize, vmem_limit, budget)


def custom_loss_ref(outputs, targets, weight):
    """Pure-JAX reference of the PyTorch forward, for verification."""
    n, c = outputs.shape
    onehot = jax.nn.one_hot(targets, c, dtype=jnp.float32)
    log_sm = jax.nn.log_softmax(outputs.astype(jnp.float32), axis=1)
    loss = -onehot * log_sm
    return jnp.mean(weight.reshape(1, c).astype(jnp.float32) * loss)


if __name__ == "__main__":
    key = jax.random.PRNGKey(0)
    k_out, k_tgt, k_out2, k_tgt2, k_out3, k_tgt3, k_w3 = jax.random.split(key, 7)

    weight = jnp.array([1.0, 5.0, 10.0], dtype=jnp.float32)

    # Exact example values from the original script (N=2, C=3; lane-dense path).
    ex_out = jnp.array([[0.9, 0.5, 0.05], [0.01, 0.2, 0.7]], dtype=jnp.float32)
    ex_tgt = jnp.array([0, 1], dtype=jnp.int32)
    ex_loss = custom_loss(ex_out, ex_tgt, weight)
    jax.block_until_ready(ex_loss)
    ex_ref = custom_loss_ref(ex_out, ex_tgt, weight)
    assert jnp.allclose(ex_loss, ex_ref, rtol=1e-5, atol=1e-5), (ex_loss, ex_ref)

    # Small random batch (lane-dense path, f32).
    N, C = 8, 3
    outputs = jax.random.normal(k_out, (N, C), dtype=jnp.float32)
    targets = jax.random.randint(k_tgt, (N,), 0, C, dtype=jnp.int32)
    loss = custom_loss(outputs, targets, weight)
    jax.block_until_ready(loss)
    ref = custom_loss_ref(outputs, targets, weight)
    assert jnp.allclose(loss, ref, rtol=1e-5, atol=1e-5), (loss, ref)

    # Ragged batch in bf16 (lane-dense path, no wrapper upcast of logits).
    N2, C2 = 37, 3
    out2 = jax.random.normal(k_out2, (N2, C2), dtype=jnp.bfloat16)
    tgt2 = jax.random.randint(k_tgt2, (N2,), 0, C2, dtype=jnp.int32)
    loss2 = custom_loss(out2, tgt2, weight)
    jax.block_until_ready(loss2)
    ref2 = custom_loss_ref(out2.astype(jnp.float32), tgt2, weight)
    assert jnp.allclose(loss2, ref2, rtol=2e-2, atol=2e-2), (loss2, ref2)

    # Larger class count (row-major path), ragged batch, random weights.
    N3, C3 = 50, 200
    out3 = jax.random.normal(k_out3, (N3, C3), dtype=jnp.float32)
    tgt3 = jax.random.randint(k_tgt3, (N3,), 0, C3, dtype=jnp.int32)
    w3 = jax.random.uniform(k_w3, (C3,), dtype=jnp.float32, minval=0.5, maxval=2.0)
    loss3 = custom_loss(out3, tgt3, w3)
    jax.block_until_ready(loss3)
    ref3 = custom_loss_ref(out3, tgt3, w3)
    assert jnp.allclose(loss3, ref3, rtol=1e-4, atol=1e-5), (loss3, ref3)

    print("KERNEL_OK")
</pallas_src>

<mosaic_0001>
module attributes {stable_mosaic.version = 11 : i64} {
  func.func @_lane_dense_kernel(%arg0: i32, %arg1: i32, %arg2: memref<3x128xf32, #tpu.memory_space<vmem>>, %arg3: memref<1x128xi32, #tpu.memory_space<vmem>>, %arg4: memref<1x128xf32, #tpu.memory_space<vmem>>, %arg5: memref<1x1x1xf32, #tpu.memory_space<vmem>>, %arg6: memref<1x128xf32, #tpu.memory_space<vmem>>) attributes {dimension_semantics = [#tpu.dimension_semantics<parallel>, #tpu.dimension_semantics<arbitrary>], iteration_bounds = array<i64: 1, 1>, scalar_prefetch = 0 : i64, scratch_operands = 1 : i64, tpu.core_type = #tpu.core_type<tc>, window_params = [{transform_indices = @transform_0, window_bounds = array<i64: 3, 128>}, {transform_indices = @transform_1, window_bounds = array<i64: 1, 128>}, {transform_indices = @transform_2, window_bounds = array<i64: 1, 128>}, {transform_indices = @transform_3, window_bounds = array<i64: 1, 1, 1>}]} {
    %c0_i32 = arith.constant 0 : i32
    %0 = arith.cmpi eq, %arg1, %c0_i32 : i32
    %1 = arith.extui %0 : i1 to i32
    %c0_i32_0 = arith.constant 0 : i32
    %2 = arith.cmpi ne, %1, %c0_i32_0 : i32
    scf.if %2 {
      %cst_16 = arith.constant 0.000000e+00 : f32
      %40 = vector.broadcast %cst_16 : f32 to vector<1x128xf32>
      %c0_17 = arith.constant 0 : index
      %c0_18 = arith.constant 0 : index
      %41 = vector.load %arg6[%c0_17, %c0_18] : memref<1x128xf32, #tpu.memory_space<vmem>>, vector<1x128xf32>
      tpu.vector_store %arg6[%c0_17, %c0_18], %40 {strides = array<i32>} : memref<1x128xf32, #tpu.memory_space<vmem>>, vector<1x128xf32>,
    } else {
    }
    %c0 = arith.constant 0 : index
    %c0_1 = arith.constant 0 : index
    %3 = vector.load %arg2[%c0, %c0_1] : memref<3x128xf32, #tpu.memory_space<vmem>>, vector<3x128xf32>
    %c0_2 = arith.constant 0 : index
    %c0_3 = arith.constant 0 : index
    %4 = vector.load %arg3[%c0_2, %c0_3] : memref<1x128xi32, #tpu.memory_space<vmem>>, vector<1x128xi32>
    %c0_4 = arith.constant 0 : index
    %c0_5 = arith.constant 0 : index
    %5 = vector.load %arg4[%c0_4, %c0_5] : memref<1x128xf32, #tpu.memory_space<vmem>>, vector<1x128xf32>
    %cst = arith.constant dense<0xFF800000> : vector<128xf32>
    %6 = vector.multi_reduction <maximumf>, %3, %cst [0] : vector<3x128xf32> to vector<128xf32>
    %7 = vector.shape_cast %6 : vector<128xf32> to vector<1x128xf32>
    %8 = vector.broadcast %7 : vector<1x128xf32> to vector<3x128xf32>
    %9 = arith.subf %3, %8 : vector<3x128xf32>
    %10 = math.exp %9 : vector<3x128xf32>
    %cst_6 = arith.constant dense<0.000000e+00> : vector<128xf32>
    %11 = vector.multi_reduction <add>, %10, %cst_6 [0] : vector<3x128xf32> to vector<128xf32>
    %12 = vector.shape_cast %11 : vector<128xf32> to vector<1x128xf32>
    %13 = tpu.iota {dimensions = array<i32: 0>} : vector<3x1xi32>
    %14 = vector.broadcast %13 : vector<3x1xi32> to vector<3x128xi32>
    %15 = vector.broadcast %4 : vector<1x128xi32> to vector<3x128xi32>
    %16 = arith.cmpi eq, %14, %15 : vector<3x128xi32>
    %cst_7 = arith.constant 0.000000e+00 : f32
    %17 = vector.broadcast %cst_7 : f32 to vector<3x128xf32>
    %18 = arith.select %16, %9, %17 : vector<3x128xi1>, vector<3x128xf32>
    %cst_8 = arith.constant dense<0.000000e+00> : vector<128xf32>
    %19 = vector.multi_reduction <add>, %18, %cst_8 [0] : vector<3x128xf32> to vector<128xf32>
    %20 = vector.shape_cast %19 : vector<128xf32> to vector<1x128xf32>
    %21 = math.log %12 : vector<1x128xf32>
    %22 = arith.subf %21, %20 : vector<1x128xf32>
    %23 = arith.mulf %5, %22 : vector<1x128xf32>
    %c1_i32 = arith.constant 1 : i32
    %24 = arith.muli %arg0, %c1_i32 : i32
    %25 = arith.addi %24, %arg1 : i32
    %c128_i32 = arith.constant 128 : i32
    %26 = arith.muli %25, %c128_i32 : i32
    %27 = tpu.iota {dimensions = array<i32: 1>} : vector<1x128xi32>
    %28 = vector.broadcast %26 : i32 to vector<1x128xi32>
    %29 = arith.addi %28, %27 : vector<1x128xi32>
    %c2_i32 = arith.constant 2 : i32
    %30 = vector.broadcast %c2_i32 : i32 to vector<1x128xi32>
    %31 = arith.cmpi slt, %29, %30 : vector<1x128xi32>
    %cst_9 = arith.constant 0.000000e+00 : f32
    %32 = vector.broadcast %cst_9 : f32 to vector<1x128xf32>
    %33 = arith.select %31, %23, %32 : vector<1x128xi1>, vector<1x128xf32>
    %c0_10 = arith.constant 0 : index
    %c0_11 = arith.constant 0 : index
    %34 = vector.load %arg6[%c0_10, %c0_11] : memref<1x128xf32, #tpu.memory_space<vmem>>, vector<1x128xf32>
    %35 = arith.addf %34, %33 : vector<1x128xf32>
    %c0_12 = arith.constant 0 : index
    %c0_13 = arith.constant 0 : index
    %36 = vector.load %arg6[%c0_12, %c0_13] : memref<1x128xf32, #tpu.memory_space<vmem>>, vector<1x128xf32>
    tpu.vector_store %arg6[%c0_12, %c0_13], %35 {strides = array<i32>} : memref<1x128xf32, #tpu.memory_space<vmem>>, vector<1x128xf32>,
    %c0_i32_14 = arith.constant 0 : i32
    %37 = arith.cmpi eq, %arg1, %c0_i32_14 : i32
    %38 = arith.extui %37 : i1 to i32
    %c0_i32_15 = arith.constant 0 : i32
    %39 = arith.cmpi ne, %38, %c0_i32_15 : i32
    scf.if %39 {
      %c0_16 = arith.constant 0 : index
      %c0_17 = arith.constant 0 : index
      %40 = vector.load %arg6[%c0_16, %c0_17] : memref<1x128xf32, #tpu.memory_space<vmem>>, vector<1x128xf32>
      %41 = vector.shape_cast %40 : vector<1x128xf32> to vector<1x1x128xf32>
      %cst_18 = arith.constant dense<0.000000e+00> : vector<1xf32>
      %42 = vector.multi_reduction <add>, %41, %cst_18 [1, 2] : vector<1x1x128xf32> to vector<1xf32>
      %43 = vector.shape_cast %42 : vector<1xf32> to vector<1x1x1xf32>
      %44 = vector.extract %43[0, 0, 0] : f32 from vector<1x1x1xf32>
      %cst_19 = arith.constant 0.166666672 : f32
      %45 = arith.mulf %44, %cst_19 : f32
      %46 = vector.broadcast %45 : f32 to vector<1x1x1xf32>
      %c0_20 = arith.constant 0 : index
      %c0_21 = arith.constant 0 : index
      %c0_22 = arith.constant 0 : index
      %47 = vector.load %arg5[%c0_20, %c0_21, %c0_22] : memref<1x1x1xf32, #tpu.memory_space<vmem>>, vector<1x1x1xf32>
      tpu.vector_store %arg5[%c0_20, %c0_21, %c0_22], %46 {strides = array<i32>} : memref<1x1x1xf32, #tpu.memory_space<vmem>>, vector<1x1x1xf32>,
    } else {
    }
    return
  }
  func.func @transform_0(%arg0: i32, %arg1: i32) -> (i32, i32) {
    %c1_i32 = arith.constant 1 : i32
    %0 = arith.muli %arg0, %c1_i32 : i32
    %1 = arith.addi %0, %arg1 : i32
    %c0_i32 = arith.constant 0 : i32
    %c0_i32_0 = arith.constant 0 : i32
    return %c0_i32, %1 : i32, i32
  }
  func.func @transform_1(%arg0: i32, %arg1: i32) -> (i32, i32) {
    %c1_i32 = arith.constant 1 : i32
    %0 = arith.muli %arg0, %c1_i32 : i32
    %1 = arith.addi %0, %arg1 : i32
    %c0_i32 = arith.constant 0 : i32
    %c0_i32_0 = arith.constant 0 : i32
    return %c0_i32, %1 : i32, i32
  }
  func.func @transform_2(%arg0: i32, %arg1: i32) -> (i32, i32) {
    %c1_i32 = arith.constant 1 : i32
    %0 = arith.muli %arg0, %c1_i32 : i32
    %1 = arith.addi %0, %arg1 : i32
    %c0_i32 = arith.constant 0 : i32
    %c0_i32_0 = arith.constant 0 : i32
    return %c0_i32, %1 : i32, i32
  }
  func.func @transform_3(%arg0: i32, %arg1: i32) -> (i32, i32, i32) {
    %c0_i32 = arith.constant 0 : i32
    %c0_i32_0 = arith.constant 0 : i32
    %c0_i32_1 = arith.constant 0 : i32
    return %arg0, %c0_i32, %c0_i32_0 : i32, i32, i32
  }
}

</mosaic_0001>

<bundles_post_ra>
// kernel: tpu_custom_call.1
= control target key start
LH: loop header
LB: loop body
LE: loop exit
PB: predicated region body
PF: predicated region fallthrough
CT: control target
= control target key end

     0   :  { %8 = vsyncpa [#allocation4], 0  ;;  %s269_s0 = inlined_call_operand.hbm [shape: f32[3,128], index: 0, kind: input, shape index: {}]   ;;  %s270_s1 = inlined_call_operand.vmem [shape: s32[1,128], index: 1, kind: input, shape index: {}]   ;;  %s271_s2 = inlined_call_operand.vmem [shape: f32[1,128], index: 2, kind: input, shape index: {}]   ;;  %s272_s3 = inlined_call_operand.hbm [shape: f32[1,1,1], index: 3, kind: output, shape index: {}]  }
   0x1   :  { %9 = vsyncpa [#allocation5], 0  ;;  %s213_s12 = smov [#allocation3]   ;;  %s165_s16 = scalar_lea.hbm %s269_s0, 64 }
   0x2   :  { %s19_s13 = sshll.u32 %s213_s12, 4  ;;  %p166_p0 = scmp.ne.s32.totalorder %s269_s0, %s165_s16  ;;  %s20_s13 = int_to_ptr.vmem [resolvable:$true] %s19_s13 }
   0x3   :  { %p169_p1 = scmp.lt.u32.totalorder %s165_s16, %s269_s0 }
   0x5   :  { %p171_p2 = pnand %p169_p1, %p166_p0 }
   0x7   :  { %174 = shalt.err (!%p171_p2)
}
   0x8   :  { %s175_s21 = scalar_lea.vmem %s20_s13, 64  ;;  %p180_p4 = scmp.lt.s32.totalorder %s20_s13, %s20_s13 }
   0x9   :  { %p176_p3 = scmp.ne.s32.totalorder %s20_s13, %s175_s21  ;;  %p181_p5 = scmp.lt.s32.totalorder %s175_s21, %s175_s21 }
   0xb   :  { %p182_p6 = por %p181_p5, %p180_p4 }
   0xd   :  { %p183_p7 = pnand %p182_p6, %p176_p3 }
   0xf   :  { %186 = shalt.err (!%p183_p7)
}
  0x10   :  { %22 = dma.hbm_to_vmem [thread:$0]  %s269_s0, 64, %s20_s13, [#allocation4]  }
  0x11   :  { %209 = dma.done.wait [#allocation4], 64  }
  0x12   :  { %210 = vsyncadd [#allocation4], 4294967232  ;;  %v214_v0 = vmov 0.0   ;;  %vm67_vm0 = vcmask 1042432   ;;  %v64_v1 = vld [vmem:[#allocation3] sm:$0x7]  ;;  %v85_v10 = vlaneseq }
  0x13   :  { %63 = vst [vmem:[#allocation2] sm:$0x1] %v214_v0  ;;  %v68_v2 = vsel %vm67_vm0, %v64_v1, -inf  ;;  %v155_v13 = vld [vmem:[%s270_s1] ss:$0 sm:$0xff]  ;;  %vm119_vm3 = vcmask 1040384  }
  0x14   :  { %v69_v3 = vrot.slane %v68_v2, 4  ;;  %v86_v12 = vshrl.u32 %v85_v10, 7  ;;  %v107_v31 = vand.u32 127, %v85_v10  ;;  %v66_v33 = vld [vmem:[%s271_s2] sm:$0x1]  ;;  %s215_s2 = smov [#allocation6]  }
  0x15   :  { %s140_s26 = sshll.u32 %s215_s2, 4  ;;  %vm132_vm4 = vcmask 0   ;;  %s141_s26 = int_to_ptr.vmem [resolvable:$true] %s140_s26 }
  0x16   :  { %v70_v4 = vmax.f32 %v68_v2, %v69_v3  ;;  %vm91_vm1 = vcmp.eq.s32.totalorder %v86_v12, %v155_v13  ;;  %vm110_vm2 = vcmp.lt.s32.totalorder %v107_v31, 2  ;;  %s187_s29 = scalar_lea.vmem %s141_s26, 16  ;;  %s191_s30 = scalar_lea.vmem %s141_s26, 32 }
  0x17   :  { %p188_p8 = scmp.ne.s32.totalorder %s141_s26, %s187_s29  ;;  %p192_p9 = scmp.lt.s32.totalorder %s141_s26, %s141_s26 }
  0x18   :  { %v71_v5 = vrot.slane %v70_v4, 2  ;;  %p193_p10 = scmp.lt.s32.totalorder %s191_s30, %s187_s29 }
  0x1a   :  { %v72_v6 = vmax.f32 %v70_v4, %v71_v5  ;;  %v112_v36 = vld [vmem:[#allocation2] sm:$0x1]  ;;  %p194_p11 = por %p193_p10, %p192_p9 }
  0x1c   :  { %v73_v7 = vrot.slane %v72_v6, 1  ;;  %p195_p12 = pnand %p194_p11, %p188_p8 }
  0x1e   :  { %v74_v8 = vmax.f32 %v72_v6, %v73_v7 }
  0x20   :  { %v75_v9 = vsub.f32 %v64_v1, %v74_v8 }
  0x22   :  { %v76_v11 = vmul.f32 1.442695, %v75_v9  ;;  %v92_v14 = vsel %vm91_vm1, %v75_v9, 0.0 }
  0x23   :  { %v93_v16 = vsel %vm67_vm0, %v92_v14, 0.0 }
  0x24   :  { %161 = vpow2.f32 %v76_v11  ;;  %v94_v19 = vrot.slane %v93_v16, 4 }
  0x26   :  { %v95_v22 = vadd.f32 %v94_v19, %v93_v16 }
  0x28   :  { %v96_v25 = vrot.slane %v95_v22, 2 }
  0x2a   :  { %v97_v27 = vadd.f32 %v96_v25, %v95_v22 }
  0x2c   :  { %v98_v28 = vrot.slane %v97_v27, 1 }
  0x2e   :  { %v162_v15 = vpop.eup %161  ;;  %v99_v29 = vadd.f32 %v98_v28, %v97_v27 }
  0x2f   :  { %v78_v17 = vsel %vm67_vm0, %v162_v15, 0.0 }
  0x30   :  { %v79_v18 = vrot.slane %v78_v17, 4 }
  0x32   :  { %v80_v20 = vadd.f32 %v79_v18, %v78_v17 }
  0x34   :  { %v81_v21 = vrot.slane %v80_v20, 2 }
  0x36   :  { %v82_v23 = vadd.f32 %v81_v21, %v80_v20 }
  0x38   :  { %v83_v24 = vrot.slane %v82_v23, 1 }
  0x3a   :  { %v84_v26 = vadd.f32 %v83_v24, %v82_v23 }
  0x3c   :  { %163 = vlog2.f32 %v84_v26 }
  0x46   :  { %v164_v30 = vpop.eup %163 }
  0x47   :  { %v101_v32 = vmul.f32 0.6931472, %v164_v30 }
  0x49   :  { %v102_v34 = vsub.f32 %v101_v32, %v99_v29 }
  0x4b   :  { %v103_v35 = vmul.f32 %v102_v34, %v66_v33 }
  0x4d   :  { %v111_v37 = vsel %vm110_vm2, %v103_v35, 0.0 }
  0x4e   :  { %v113_v38 = vadd.f32 %v112_v36, %v111_v37 }
  0x50   :  { %114 = vst [vmem:[#allocation2] sm:$0x1] %v113_v38 }
  0x57   :  { %v118_v39 = vld [vmem:[#allocation2] sm:$0x1] }
  0x58   :  { %v120_v40 = vsel %vm119_vm3, %v118_v39, 0.0 }
  0x59   :  { %121 = vadd.xlane.f32.xlu0 %v120_v40 }
  0xe6   :  { %v122_v41 = vpop.xlane.xlu0 %121 }
  0xe7   :  { %v123_v42 = vrot.slane %v122_v41, 4 }
  0xe9   :  { %v124_v43 = vadd.f32 %v123_v42, %v122_v41 }
  0xeb   :  { %v125_v44 = vrot.slane %v124_v43, 2 }
  0xed   :  { %v126_v45 = vadd.f32 %v125_v44, %v124_v43 }
  0xef   :  { %v127_v46 = vrot.slane %v126_v45, 1 }
  0xf1   :  { %v128_v47 = vadd.f32 %v127_v46, %v126_v45 }
  0xf3   :  { %156 = vpush %v128_v47 }
 0x124   :  { %s157_s27 = spop %156 }
 0x125   :  { %s130_s28 = smul.f32 0.16666667, %s157_s27 }
 0x127   :  { %v131_v48 = vstv %s130_s28 }
 0x128   :  { %133 = vst.msk [vmem:[#allocation6] sm:$0x1] %vm132_vm4, %v131_v48 }
 0x129   :  { %198 = shalt.err (!%p195_p12)
}
 0x12a   :  { %s199_s6 = scalar_lea.hbm %s272_s3, 16 }
 0x12b   :  { %p200_p13 = scmp.ne.s32.totalorder %s272_s3, %s199_s6  ;;  %p203_p0 = scmp.lt.u32.totalorder %s199_s6, %s272_s3 }
 0x12d   :  { %p205_p1 = pnand %p203_p0, %p200_p13 }
 0x12f   :  { %208 = shalt.err (!%p205_p1)
}
 0x130   :  { %143 = dma.vmem_to_hbm [thread:$0]  %s141_s26, 16, %s272_s3, [#allocation5]  }
 0x131   :  { %211 = dma.done.wait [#allocation5], 16  }
 0x132   :  { %212 = vsyncadd [#allocation5], 4294967280 }
 0x133   :  { %147 = vsyncpa [#allocation4], 1 }
 0x134   :  { %148 = vsyncpa [#allocation5], 1 }

</bundles_post_ra>
